<compile_context>
chip_gen: v7x
topology: tpu7x:2x2x1
jax: 0.10.0
libtpu: 0.0.40
codegen_flags: <defaults>
</compile_context>

<pallas_src>
import functools

import jax
import jax.numpy as jnp
from jax.experimental import pallas as pl
from jax.experimental.pallas import tpu as pltpu


def _resblock_kernel(x_ref, w1_ref, b1_ref, w2_ref, b2_ref, o_ref, xz_ref, *,
                     H, W, C, bt, padl, res_scale, mxu_dtype):
    HW = H * W

    # Column-validity masks for the flat-shift im2col: taps with dx==0 must
    # not read column -1 (output column j==0 is zero there) and taps with
    # dx==2 must not read column W (j==W-1 zero).  Row out-of-range reads are
    # handled by the zero halos of the padded scratch.
    j = jax.lax.broadcasted_iota(jnp.int32, (1, HW), 1) % W
    keep_l = j != 0
    keep_r = j != (W - 1)

    # Zero the lane-aligned halo regions of the padded flat scratch.  Done
    # every grid step (a few KB of aligned stores) so it stays correct when
    # the "parallel" batch axis is split across TensorCores.
    xz_ref[:, :padl] = jnp.zeros((C, padl), jnp.float32)
    xz_ref[:, padl + HW:] = jnp.zeros((C, padl), jnp.float32)

    def conv3x3(w_ref, b_ref):
        # Sublane-stacked cols^T: rows ordered (dy, dx) major, cin minor,
        # matching W_k = w.transpose(0, 2, 3, 1).reshape(C, 9C).
        taps = []
        for dy in range(3):
            for dx in range(3):
                a = padl + (dy - 1) * W + (dx - 1)
                t = xz_ref[:, a:a + HW]                          # (C, HW)
                if dx == 0:
                    t = jnp.where(keep_l, t, jnp.zeros_like(t))
                elif dx == 2:
                    t = jnp.where(keep_r, t, jnp.zeros_like(t))
                taps.append(t)
        cols = jnp.concatenate(taps, axis=0).astype(mxu_dtype)   # (9C, HW)
        y = jnp.dot(w_ref[...], cols, preferred_element_type=jnp.float32)
        return y + b_ref[...]                                    # (C, HW) f32

    for bi in range(bt):                                         # static unroll
        xb = x_ref[bi].astype(jnp.float32)                       # (C, HW)
        # conv1 + ReLU (bias before ReLU, as in nn.Conv2d -> nn.ReLU)
        xz_ref[:, padl:padl + HW] = xb
        y1 = jnp.maximum(conv3x3(w1_ref, b1_ref), 0.0)
        # conv2
        xz_ref[:, padl:padl + HW] = y1
        y2 = conv3x3(w2_ref, b2_ref)
        # residual: identity + res_scale * conv2(relu(conv1(x)))
        o_ref[bi] = (xb + res_scale * y2).astype(o_ref.dtype)


def _pick_batch_tile(B, H, W, C):
    """Largest divisor of B with a modest per-step I/O footprint that still
    leaves >= 2 grid steps when B >= 2 (v7x has two TensorCores)."""
    io_per_image = 2 * 4 * C * H * W          # f32 in + out block per image
    cap_imgs = max(1, (4 << 20) // max(io_per_image, 1))
    best = 1
    for d in range(1, B + 1):
        if B % d:
            continue
        if d > cap_imgs:
            continue
        if B >= 2 and (B // d) < 2:
            continue
        best = d
    return best


def residual_block_no_bn(x_nchw, w1, b1, w2, b2, res_scale=1.0, *,
                         mxu_dtype=jnp.bfloat16, batch_tile=None):
    """x_nchw: (B, C, H, W); w: (C, C, 3, 3); b: (C,). Returns NCHW."""
    B, C, H, W = x_nchw.shape
    if w1.shape != (C, C, 3, 3) or w2.shape != (C, C, 3, 3):
        raise ValueError("expected (C, C, 3, 3) conv weights")
    if b1.shape != (C,) or b2.shape != (C,):
        raise ValueError("expected (C,) biases")
    HW = H * W

    # NCHW flattened over spatial: contiguous reshape (free), no transpose.
    x_flat = x_nchw.reshape(B, C, HW)

    # (Cout, Cin, 3, 3) -> (Cout, 3, 3, Cin) -> (Cout, 9*Cin); column order
    # (dy, dx, cin) matches the sublane-stacked cols^T built in the kernel.
    w1_k = jnp.transpose(w1, (0, 2, 3, 1)).reshape(C, 9 * C).astype(mxu_dtype)
    w2_k = jnp.transpose(w2, (0, 2, 3, 1)).reshape(C, 9 * C).astype(mxu_dtype)
    b1_c = b1.reshape(C, 1).astype(jnp.float32)
    b2_c = b2.reshape(C, 1).astype(jnp.float32)

    bt = _pick_batch_tile(B, H, W, C) if batch_tile is None else batch_tile
    assert B % bt == 0, "batch_tile must divide B"
    padl = ((W + 1 + 127) // 128) * 128       # lane-aligned halo width

    elt_in = x_nchw.dtype.itemsize
    elt_mx = jnp.dtype(mxu_dtype).itemsize
    # Per-step VMEM: double-buffered I/O blocks + weights/biases + padded
    # scratch + im2col temporaries (taps, cols, matmul results).
    per_step = (
        2 * 2 * bt * C * HW * elt_in
        + 2 * (2 * 9 * C * C * elt_mx + 2 * C * 4)
        + C * (2 * padl + HW) * 4
        + 9 * C * HW * (4 + elt_mx) + 3 * C * HW * 4)
    try:
        cap = int(pltpu.get_tpu_info().vmem_capacity_bytes) * 3 // 4
    except Exception:
        cap = 48 * 1024 * 1024                # safe under v7x's 64 MiB VMEM
    vmem_limit = int(min(cap, max(8 * 1024 * 1024, 2 * per_step)))

    flops = 2 * (2 * B * HW * (9 * C) * C)    # two im2col matmuls
    bytes_accessed = (2 * B * C * HW * elt_in + 2 * 9 * C * C * elt_mx + 2 * C * 4)
    cost = pl.CostEstimate(flops=flops, transcendentals=0,
                           bytes_accessed=bytes_accessed)

    kernel = functools.partial(
        _resblock_kernel, H=H, W=W, C=C, bt=bt, padl=padl,
        res_scale=float(res_scale), mxu_dtype=mxu_dtype)

    out_flat = pl.pallas_call(
        kernel,
        out_shape=jax.ShapeDtypeStruct((B, C, HW), x_nchw.dtype),
        grid_spec=pltpu.PrefetchScalarGridSpec(
            num_scalar_prefetch=0,
            grid=(B // bt,),
            in_specs=[
                pl.BlockSpec((bt, C, HW), lambda b: (b, 0, 0)),
                # Weights/biases: constant index_map -> DMA'd only once.
                # (pipeline_mode=pl.Buffered(1) would also single-buffer the
                #  allocation; left at the default double buffer since they
                #  are tiny at this C.)
                pl.BlockSpec((C, 9 * C), lambda b: (0, 0)),
                pl.BlockSpec((C, 1), lambda b: (0, 0)),
                pl.BlockSpec((C, 9 * C), lambda b: (0, 0)),
                pl.BlockSpec((C, 1), lambda b: (0, 0)),
            ],
            out_specs=pl.BlockSpec((bt, C, HW), lambda b: (b, 0, 0)),
            scratch_shapes=[pltpu.VMEM((C, 2 * padl + HW), jnp.float32)],
        ),
        compiler_params=pltpu.CompilerParams(
            dimension_semantics=("parallel",),
            vmem_limit_bytes=vmem_limit),
        cost_estimate=cost,
    )(x_flat, w1_k, b1_c, w2_k, b2_c)

    return out_flat.reshape(B, C, H, W)       # still NCHW; free reshape


def _reference(x_nchw, w1, b1, w2, b2, res_scale=1.0):
    """Pure-JAX reference (XLA convs) for correctness checking."""
    dn = jax.lax.conv_dimension_numbers(x_nchw.shape, w1.shape,
                                        ("NCHW", "OIHW", "NCHW"))
    y = jax.lax.conv_general_dilated(x_nchw, w1, (1, 1), ((1, 1), (1, 1)),
                                     dimension_numbers=dn)
    y = y + b1.reshape(1, -1, 1, 1)
    y = jnp.maximum(y, 0.0)
    y = jax.lax.conv_general_dilated(y, w2, (1, 1), ((1, 1), (1, 1)),
                                     dimension_numbers=dn)
    y = y + b2.reshape(1, -1, 1, 1)
    return x_nchw + y * res_scale


if __name__ == "__main__":
    B, C, H, W = 2, 4, 16, 16     # num_feat = 4 (synthetic small config)
    res_scale = 1.0

    key = jax.random.PRNGKey(0)
    kx, kw1, kb1, kw2, kb2 = jax.random.split(key, 5)

    x = jax.random.normal(kx, (B, C, H, W), dtype=jnp.float32)
    # deterministic synthetic parameter init (nn.Conv2d shapes)
    w1 = 0.1 * jax.random.normal(kw1, (C, C, 3, 3), dtype=jnp.float32)
    b1 = 0.1 * jax.random.normal(kb1, (C,), dtype=jnp.float32)
    w2 = 0.1 * jax.random.normal(kw2, (C, C, 3, 3), dtype=jnp.float32)
    b2 = 0.1 * jax.random.normal(kb2, (C,), dtype=jnp.float32)

    ref = jax.block_until_ready(_reference(x, w1, b1, w2, b2, res_scale))

    # Exact path (f32 MXU operands): tight tolerance vs. the XLA reference.
    out_f32 = jax.block_until_ready(
        residual_block_no_bn(x, w1, b1, w2, b2, res_scale,
                             mxu_dtype=jnp.float32))
    assert out_f32.shape == (B, C, H, W)
    assert jnp.allclose(out_f32, ref, atol=1e-4, rtol=1e-4), \
        f"f32 path max abs err {jnp.max(jnp.abs(out_f32 - ref))}"

    # Default path (bf16 MXU operands, f32 accumulate): looser tolerance.
    out_bf16 = jax.block_until_ready(
        residual_block_no_bn(x, w1, b1, w2, b2, res_scale))
    assert out_bf16.shape == (B, C, H, W)
    assert jnp.allclose(out_bf16, ref, atol=5e-2, rtol=5e-2), \
        f"bf16 path max abs err {jnp.max(jnp.abs(out_bf16 - ref))}"

    print("KERNEL_OK")
</pallas_src>

<mosaic_0001>
module attributes {stable_mosaic.version = 11 : i64} {
  func.func @_resblock_kernel(%arg0: i32, %arg1: memref<1x4x256xf32, #tpu.memory_space<vmem>>, %arg2: memref<4x36xf32, #tpu.memory_space<vmem>>, %arg3: memref<4x1xf32, #tpu.memory_space<vmem>>, %arg4: memref<4x36xf32, #tpu.memory_space<vmem>>, %arg5: memref<4x1xf32, #tpu.memory_space<vmem>>, %arg6: memref<1x4x256xf32, #tpu.memory_space<vmem>>, %arg7: memref<4x512xf32, #tpu.memory_space<vmem>>) attributes {dimension_semantics = [#tpu.dimension_semantics<parallel>], iteration_bounds = array<i64: 2>, scalar_prefetch = 0 : i64, scratch_operands = 1 : i64, tpu.core_type = #tpu.core_type<tc>, window_params = [{transform_indices = @transform_0, window_bounds = array<i64: 1, 4, 256>}, {pipeline_mode = #tpu.pipeline_mode<synchronous>, transform_indices = @transform_1, window_bounds = array<i64: 4, 36>}, {pipeline_mode = #tpu.pipeline_mode<synchronous>, transform_indices = @transform_2, window_bounds = array<i64: 4, 1>}, {pipeline_mode = #tpu.pipeline_mode<synchronous>, transform_indices = @transform_3, window_bounds = array<i64: 4, 36>}, {pipeline_mode = #tpu.pipeline_mode<synchronous>, transform_indices = @transform_4, window_bounds = array<i64: 4, 1>}, {transform_indices = @transform_5, window_bounds = array<i64: 1, 4, 256>}]} {
    %0 = tpu.iota {dimensions = array<i32: 1>} : vector<1x256xi32>
    %c16_i32 = arith.constant 16 : i32
    %c0_i32 = arith.constant 0 : i32
    %1 = arith.cmpi eq, %c16_i32, %c0_i32 : i32
    %c1_i32 = arith.constant 1 : i32
    %2 = arith.select %1, %c1_i32, %c16_i32 : i32
    %3 = vector.broadcast %2 : i32 to vector<1x256xi32>
    %4 = arith.remsi %0, %3 : vector<1x256xi32>
    %c0_i32_0 = arith.constant 0 : i32
    %5 = vector.broadcast %c0_i32_0 : i32 to vector<1x256xi32>
    %6 = arith.cmpi ne, %4, %5 : vector<1x256xi32>
    %c0_i32_1 = arith.constant 0 : i32
    %7 = vector.broadcast %c0_i32_1 : i32 to vector<1x256xi32>
    %8 = arith.cmpi slt, %4, %7 : vector<1x256xi32>
    %c0_i32_2 = arith.constant 0 : i32
    %9 = arith.cmpi slt, %2, %c0_i32_2 : i32
    %10 = vector.broadcast %9 : i1 to vector<1x256xi1>
    %11 = vector.broadcast %10 : vector<1x256xi1> to vector<1x256xi1>
    %12 = arith.xori %8, %11 : vector<1x256xi1>
    %13 = arith.andi %12, %6 : vector<1x256xi1>
    %14 = vector.broadcast %2 : i32 to vector<1x256xi32>
    %15 = arith.addi %4, %14 : vector<1x256xi32>
    %16 = arith.select %13, %15, %4 : vector<1x256xi1>, vector<1x256xi32>
    %c0_i32_3 = arith.constant 0 : i32
    %17 = vector.broadcast %c0_i32_3 : i32 to vector<1x256xi32>
    %18 = arith.cmpi ne, %16, %17 : vector<1x256xi32>
    %c15_i32 = arith.constant 15 : i32
    %19 = vector.broadcast %c15_i32 : i32 to vector<1x256xi32>
    %20 = arith.cmpi ne, %16, %19 : vector<1x256xi32>
    %cst = arith.constant 0.000000e+00 : f32
    %21 = vector.broadcast %cst : f32 to vector<4x128xf32>
    %c0 = arith.constant 0 : index
    %c0_4 = arith.constant 0 : index
    %22 = vector.load %arg7[%c0, %c0_4] : memref<4x512xf32, #tpu.memory_space<vmem>>, vector<4x128xf32>
    tpu.vector_store %arg7[%c0, %c0_4], %21 {strides = array<i32>} : memref<4x512xf32, #tpu.memory_space<vmem>>, vector<4x128xf32>,
    %cst_5 = arith.constant 0.000000e+00 : f32
    %23 = vector.broadcast %cst_5 : f32 to vector<4x128xf32>
    %c0_6 = arith.constant 0 : index
    %c384 = arith.constant 384 : index
    %24 = vector.load %arg7[%c0_6, %c384] : memref<4x512xf32, #tpu.memory_space<vmem>>, vector<4x128xf32>
    tpu.vector_store %arg7[%c0_6, %c384], %23 {strides = array<i32>} : memref<4x512xf32, #tpu.memory_space<vmem>>, vector<4x128xf32>,
    %c0_7 = arith.constant 0 : index
    %c0_8 = arith.constant 0 : index
    %c0_9 = arith.constant 0 : index
    %25 = vector.load %arg1[%c0_7, %c0_8, %c0_9] : memref<1x4x256xf32, #tpu.memory_space<vmem>>, vector<1x4x256xf32>
    %26 = vector.shape_cast %25 : vector<1x4x256xf32> to vector<4x256xf32>
    %c0_10 = arith.constant 0 : index
    %c128 = arith.constant 128 : index
    %27 = vector.load %arg7[%c0_10, %c128] : memref<4x512xf32, #tpu.memory_space<vmem>>, vector<4x256xf32>
    tpu.vector_store %arg7[%c0_10, %c128], %26 {strides = array<i32>} : memref<4x512xf32, #tpu.memory_space<vmem>>, vector<4x256xf32>,
    %c0_11 = arith.constant 0 : index
    %c111 = arith.constant 111 : index
    %28 = vector.load %arg7[%c0_11, %c111] : memref<4x512xf32, #tpu.memory_space<vmem>>, vector<4x256xf32>
    %cst_12 = arith.constant 0.000000e+00 : f32
    %29 = vector.broadcast %cst_12 : f32 to vector<4x256xf32>
    %30 = vector.shape_cast %18 : vector<1x256xi1> to vector<1x256xi1>
    %31 = vector.broadcast %30 : vector<1x256xi1> to vector<4x256xi1>
    %32 = arith.select %31, %28, %29 : vector<4x256xi1>, vector<4x256xf32>
    %c0_13 = arith.constant 0 : index
    %c112 = arith.constant 112 : index
    %33 = vector.load %arg7[%c0_13, %c112] : memref<4x512xf32, #tpu.memory_space<vmem>>, vector<4x256xf32>
    %c0_14 = arith.constant 0 : index
    %c113 = arith.constant 113 : index
    %34 = vector.load %arg7[%c0_14, %c113] : memref<4x512xf32, #tpu.memory_space<vmem>>, vector<4x256xf32>
    %cst_15 = arith.constant 0.000000e+00 : f32
    %35 = vector.broadcast %cst_15 : f32 to vector<4x256xf32>
    %36 = vector.shape_cast %20 : vector<1x256xi1> to vector<1x256xi1>
    %37 = vector.broadcast %36 : vector<1x256xi1> to vector<4x256xi1>
    %38 = arith.select %37, %34, %35 : vector<4x256xi1>, vector<4x256xf32>
    %c0_16 = arith.constant 0 : index
    %c127 = arith.constant 127 : index
    %39 = vector.load %arg7[%c0_16, %c127] : memref<4x512xf32, #tpu.memory_space<vmem>>, vector<4x256xf32>
    %cst_17 = arith.constant 0.000000e+00 : f32
    %40 = vector.broadcast %cst_17 : f32 to vector<4x256xf32>
    %41 = vector.shape_cast %18 : vector<1x256xi1> to vector<1x256xi1>
    %42 = vector.broadcast %41 : vector<1x256xi1> to vector<4x256xi1>
    %43 = arith.select %42, %39, %40 : vector<4x256xi1>, vector<4x256xf32>
    %c0_18 = arith.constant 0 : index
    %c128_19 = arith.constant 128 : index
    %44 = vector.load %arg7[%c0_18, %c128_19] : memref<4x512xf32, #tpu.memory_space<vmem>>, vector<4x256xf32>
    %c0_20 = arith.constant 0 : index
    %c129 = arith.constant 129 : index
    %45 = vector.load %arg7[%c0_20, %c129] : memref<4x512xf32, #tpu.memory_space<vmem>>, vector<4x256xf32>
    %cst_21 = arith.constant 0.000000e+00 : f32
    %46 = vector.broadcast %cst_21 : f32 to vector<4x256xf32>
    %47 = vector.shape_cast %20 : vector<1x256xi1> to vector<1x256xi1>
    %48 = vector.broadcast %47 : vector<1x256xi1> to vector<4x256xi1>
    %49 = arith.select %48, %45, %46 : vector<4x256xi1>, vector<4x256xf32>
    %c0_22 = arith.constant 0 : index
    %c143 = arith.constant 143 : index
    %50 = vector.load %arg7[%c0_22, %c143] : memref<4x512xf32, #tpu.memory_space<vmem>>, vector<4x256xf32>
    %cst_23 = arith.constant 0.000000e+00 : f32
    %51 = vector.broadcast %cst_23 : f32 to vector<4x256xf32>
    %52 = vector.shape_cast %18 : vector<1x256xi1> to vector<1x256xi1>
    %53 = vector.broadcast %52 : vector<1x256xi1> to vector<4x256xi1>
    %54 = arith.select %53, %50, %51 : vector<4x256xi1>, vector<4x256xf32>
    %c0_24 = arith.constant 0 : index
    %c144 = arith.constant 144 : index
    %55 = vector.load %arg7[%c0_24, %c144] : memref<4x512xf32, #tpu.memory_space<vmem>>, vector<4x256xf32>
    %c0_25 = arith.constant 0 : index
    %c145 = arith.constant 145 : index
    %56 = vector.load %arg7[%c0_25, %c145] : memref<4x512xf32, #tpu.memory_space<vmem>>, vector<4x256xf32>
    %cst_26 = arith.constant 0.000000e+00 : f32
    %57 = vector.broadcast %cst_26 : f32 to vector<4x256xf32>
    %58 = vector.shape_cast %20 : vector<1x256xi1> to vector<1x256xi1>
    %59 = vector.broadcast %58 : vector<1x256xi1> to vector<4x256xi1>
    %60 = arith.select %59, %56, %57 : vector<4x256xi1>, vector<4x256xf32>
    %61 = tpu.concatenate %32, %33, %38, %43, %44, %49, %54, %55, %60 in 0 : vector<4x256xf32>, vector<4x256xf32>, vector<4x256xf32>, vector<4x256xf32>, vector<4x256xf32>, vector<4x256xf32>, vector<4x256xf32>, vector<4x256xf32>, vector<4x256xf32> -> vector<36x256xf32>
    %c0_27 = arith.constant 0 : index
    %c0_28 = arith.constant 0 : index
    %62 = vector.load %arg2[%c0_27, %c0_28] : memref<4x36xf32, #tpu.memory_space<vmem>>, vector<4x36xf32>
    %cst_29 = arith.constant dense<0.000000e+00> : vector<4x256xf32>
    %63 = tpu.matmul %62, %61, %cst_29 {dimension_numbers = #tpu.dot_dimension_numbers<[1], [0], [0], [1], [0, 0, 1, 1], [], []>} : vector<4x36xf32>, vector<36x256xf32>, vector<4x256xf32> -> vector<4x256xf32>
    %c0_30 = arith.constant 0 : index
    %c0_31 = arith.constant 0 : index
    %64 = vector.load %arg3[%c0_30, %c0_31] : memref<4x1xf32, #tpu.memory_space<vmem>>, vector<4x1xf32>
    %65 = vector.broadcast %64 : vector<4x1xf32> to vector<4x256xf32>
    %66 = arith.addf %63, %65 : vector<4x256xf32>
    %cst_32 = arith.constant 0.000000e+00 : f32
    %67 = vector.broadcast %cst_32 : f32 to vector<4x256xf32>
    %68 = arith.maximumf %66, %67 : vector<4x256xf32>
    %c0_33 = arith.constant 0 : index
    %c128_34 = arith.constant 128 : index
    %69 = vector.load %arg7[%c0_33, %c128_34] : memref<4x512xf32, #tpu.memory_space<vmem>>, vector<4x256xf32>
    tpu.vector_store %arg7[%c0_33, %c128_34], %68 {strides = array<i32>} : memref<4x512xf32, #tpu.memory_space<vmem>>, vector<4x256xf32>,
    %c0_35 = arith.constant 0 : index
    %c111_36 = arith.constant 111 : index
    %70 = vector.load %arg7[%c0_35, %c111_36] : memref<4x512xf32, #tpu.memory_space<vmem>>, vector<4x256xf32>
    %cst_37 = arith.constant 0.000000e+00 : f32
    %71 = vector.broadcast %cst_37 : f32 to vector<4x256xf32>
    %72 = vector.shape_cast %18 : vector<1x256xi1> to vector<1x256xi1>
    %73 = vector.broadcast %72 : vector<1x256xi1> to vector<4x256xi1>
    %74 = arith.select %73, %70, %71 : vector<4x256xi1>, vector<4x256xf32>
    %c0_38 = arith.constant 0 : index
    %c112_39 = arith.constant 112 : index
    %75 = vector.load %arg7[%c0_38, %c112_39] : memref<4x512xf32, #tpu.memory_space<vmem>>, vector<4x256xf32>
    %c0_40 = arith.constant 0 : index
    %c113_41 = arith.constant 113 : index
    %76 = vector.load %arg7[%c0_40, %c113_41] : memref<4x512xf32, #tpu.memory_space<vmem>>, vector<4x256xf32>
    %cst_42 = arith.constant 0.000000e+00 : f32
    %77 = vector.broadcast %cst_42 : f32 to vector<4x256xf32>
    %78 = vector.shape_cast %20 : vector<1x256xi1> to vector<1x256xi1>
    %79 = vector.broadcast %78 : vector<1x256xi1> to vector<4x256xi1>
    %80 = arith.select %79, %76, %77 : vector<4x256xi1>, vector<4x256xf32>
    %c0_43 = arith.constant 0 : index
    %c127_44 = arith.constant 127 : index
    %81 = vector.load %arg7[%c0_43, %c127_44] : memref<4x512xf32, #tpu.memory_space<vmem>>, vector<4x256xf32>
    %cst_45 = arith.constant 0.000000e+00 : f32
    %82 = vector.broadcast %cst_45 : f32 to vector<4x256xf32>
    %83 = vector.shape_cast %18 : vector<1x256xi1> to vector<1x256xi1>
    %84 = vector.broadcast %83 : vector<1x256xi1> to vector<4x256xi1>
    %85 = arith.select %84, %81, %82 : vector<4x256xi1>, vector<4x256xf32>
    %c0_46 = arith.constant 0 : index
    %c128_47 = arith.constant 128 : index
    %86 = vector.load %arg7[%c0_46, %c128_47] : memref<4x512xf32, #tpu.memory_space<vmem>>, vector<4x256xf32>
    %c0_48 = arith.constant 0 : index
    %c129_49 = arith.constant 129 : index
    %87 = vector.load %arg7[%c0_48, %c129_49] : memref<4x512xf32, #tpu.memory_space<vmem>>, vector<4x256xf32>
    %cst_50 = arith.constant 0.000000e+00 : f32
    %88 = vector.broadcast %cst_50 : f32 to vector<4x256xf32>
    %89 = vector.shape_cast %20 : vector<1x256xi1> to vector<1x256xi1>
    %90 = vector.broadcast %89 : vector<1x256xi1> to vector<4x256xi1>
    %91 = arith.select %90, %87, %88 : vector<4x256xi1>, vector<4x256xf32>
    %c0_51 = arith.constant 0 : index
    %c143_52 = arith.constant 143 : index
    %92 = vector.load %arg7[%c0_51, %c143_52] : memref<4x512xf32, #tpu.memory_space<vmem>>, vector<4x256xf32>
    %cst_53 = arith.constant 0.000000e+00 : f32
    %93 = vector.broadcast %cst_53 : f32 to vector<4x256xf32>
    %94 = vector.shape_cast %18 : vector<1x256xi1> to vector<1x256xi1>
    %95 = vector.broadcast %94 : vector<1x256xi1> to vector<4x256xi1>
    %96 = arith.select %95, %92, %93 : vector<4x256xi1>, vector<4x256xf32>
    %c0_54 = arith.constant 0 : index
    %c144_55 = arith.constant 144 : index
    %97 = vector.load %arg7[%c0_54, %c144_55] : memref<4x512xf32, #tpu.memory_space<vmem>>, vector<4x256xf32>
    %c0_56 = arith.constant 0 : index
    %c145_57 = arith.constant 145 : index
    %98 = vector.load %arg7[%c0_56, %c145_57] : memref<4x512xf32, #tpu.memory_space<vmem>>, vector<4x256xf32>
    %cst_58 = arith.constant 0.000000e+00 : f32
    %99 = vector.broadcast %cst_58 : f32 to vector<4x256xf32>
    %100 = vector.shape_cast %20 : vector<1x256xi1> to vector<1x256xi1>
    %101 = vector.broadcast %100 : vector<1x256xi1> to vector<4x256xi1>
    %102 = arith.select %101, %98, %99 : vector<4x256xi1>, vector<4x256xf32>
    %103 = tpu.concatenate %74, %75, %80, %85, %86, %91, %96, %97, %102 in 0 : vector<4x256xf32>, vector<4x256xf32>, vector<4x256xf32>, vector<4x256xf32>, vector<4x256xf32>, vector<4x256xf32>, vector<4x256xf32>, vector<4x256xf32>, vector<4x256xf32> -> vector<36x256xf32>
    %c0_59 = arith.constant 0 : index
    %c0_60 = arith.constant 0 : index
    %104 = vector.load %arg4[%c0_59, %c0_60] : memref<4x36xf32, #tpu.memory_space<vmem>>, vector<4x36xf32>
    %cst_61 = arith.constant dense<0.000000e+00> : vector<4x256xf32>
    %105 = tpu.matmul %104, %103, %cst_61 {dimension_numbers = #tpu.dot_dimension_numbers<[1], [0], [0], [1], [0, 0, 1, 1], [], []>} : vector<4x36xf32>, vector<36x256xf32>, vector<4x256xf32> -> vector<4x256xf32>
    %c0_62 = arith.constant 0 : index
    %c0_63 = arith.constant 0 : index
    %106 = vector.load %arg5[%c0_62, %c0_63] : memref<4x1xf32, #tpu.memory_space<vmem>>, vector<4x1xf32>
    %107 = vector.broadcast %106 : vector<4x1xf32> to vector<4x256xf32>
    %108 = arith.addf %105, %107 : vector<4x256xf32>
    %cst_64 = arith.constant 1.000000e+00 : f32
    %109 = vector.broadcast %cst_64 : f32 to vector<4x256xf32>
    %110 = arith.mulf %109, %108 : vector<4x256xf32>
    %111 = arith.addf %26, %110 : vector<4x256xf32>
    %c0_65 = arith.constant 0 : index
    %c0_66 = arith.constant 0 : index
    %c0_67 = arith.constant 0 : index
    %112 = vector.load %arg6[%c0_65, %c0_66, %c0_67] : memref<1x4x256xf32, #tpu.memory_space<vmem>>, vector<1x4x256xf32>
    %113 = vector.shape_cast %112 : vector<1x4x256xf32> to vector<4x256xf32>
    %114 = vector.shape_cast %111 : vector<4x256xf32> to vector<1x4x256xf32>
    tpu.vector_store %arg6[%c0_65, %c0_66, %c0_67], %114 {strides = array<i32>} : memref<1x4x256xf32, #tpu.memory_space<vmem>>, vector<1x4x256xf32>,
    return
  }
  func.func @transform_0(%arg0: i32) -> (i32, i32, i32) {
    %c0_i32 = arith.constant 0 : i32
    %c0_i32_0 = arith.constant 0 : i32
    %c0_i32_1 = arith.constant 0 : i32
    return %arg0, %c0_i32, %c0_i32_0 : i32, i32, i32
  }
  func.func @transform_1(%arg0: i32) -> (i32, i32) {
    %c0_i32 = arith.constant 0 : i32
    %c0_i32_0 = arith.constant 0 : i32
    %c0_i32_1 = arith.constant 0 : i32
    return %c0_i32, %c0_i32_0 : i32, i32
  }
  func.func @transform_2(%arg0: i32) -> (i32, i32) {
    %c0_i32 = arith.constant 0 : i32
    %c0_i32_0 = arith.constant 0 : i32
    %c0_i32_1 = arith.constant 0 : i32
    return %c0_i32, %c0_i32_0 : i32, i32
  }
  func.func @transform_3(%arg0: i32) -> (i32, i32) {
    %c0_i32 = arith.constant 0 : i32
    %c0_i32_0 = arith.constant 0 : i32
    %c0_i32_1 = arith.constant 0 : i32
    return %c0_i32, %c0_i32_0 : i32, i32
  }
  func.func @transform_4(%arg0: i32) -> (i32, i32) {
    %c0_i32 = arith.constant 0 : i32
    %c0_i32_0 = arith.constant 0 : i32
    %c0_i32_1 = arith.constant 0 : i32
    return %c0_i32, %c0_i32_0 : i32, i32
  }
  func.func @transform_5(%arg0: i32) -> (i32, i32, i32) {
    %c0_i32 = arith.constant 0 : i32
    %c0_i32_0 = arith.constant 0 : i32
    %c0_i32_1 = arith.constant 0 : i32
    return %arg0, %c0_i32, %c0_i32_0 : i32, i32, i32
  }
}

</mosaic_0001>

<bundles_post_ra>
// kernel: tpu_custom_call.1
= control target key start
LH: loop header
LB: loop body
LE: loop exit
PB: predicated region body
PF: predicated region fallthrough
CT: control target
= control target key end

     0   :  { %10 = vsyncpa [#allocation4], 0  ;;  %s1508_s0 = inlined_call_operand.hbm [shape: f32[2,4,256], index: 0, kind: input, shape index: {}]   ;;  %s1509_s1 = inlined_call_operand.vmem [shape: f32[4,36], index: 1, kind: input, shape index: {}]   ;;  %s1510_s2 = inlined_call_operand.vmem [shape: f32[4,1], index: 2, kind: input, shape index: {}]   ;;  %s1511_s3 = inlined_call_operand.vmem [shape: f32[4,36], index: 3, kind: input, shape index: {}]   ;;  %s1512_s4 = inlined_call_operand.vmem [shape: f32[4,1], index: 4, kind: input, shape index: {}]   ;;  %s1513_s5 = inlined_call_operand.hbm [shape: f32[2,4,256], index: 5, kind: output, shape index: {}]  }
   0x1   :  { %12 = vsyncpa [#allocation4 + $0x1], 0 }
   0x2   :  { %13 = vsyncpa [#allocation5], 0 }
   0x3   :  { %15 = vsyncpa [#allocation5 + $0x1], 0  ;;  %s1144_s18 = smov 0   ;;  %s1146_s19 = smov 0  }
   0x4   :  { %s1148_s20 = smov 0   ;;  %s1150_s21 = smov 0  }
   0x5 LB: > { %s1165_s22 = sadd.s32 4294967295, %s1100_s21   ;;  %s826_s23 = sadd.s32 4294967294, %s1100_s21   ;;  %s1100_s21 = sphi %s1150_s21, %s1536_s21   ;;  %s1096_s20 = sphi %s1148_s20, %s1535_s20   ;;  %s1092_s19 = sphi %s1146_s19, %s1534_s19   ;;  %s1088_s18 = sphi %s1144_s18, %s1533_s18  }
   0x6   : > { %s1169_s24 = sadd.s32 1, %s1100_s21   ;;  %s28_s25 = sadd.s32 1, %s1096_s20 }
   0x7   : > { %s25_s26 = ssub.s32 %s1100_s21, %s1169_s24  ;;  %p35_p0 = scmp.ne.s32.totalorder %s1096_s20, %s1092_s19 }
   0x8   : > { %p26_p1 = scmp.eq.s32.totalorder %s25_s26, 0  ;;  %p36_p2 = scmp.eq.s32.totalorder %s1100_s21, 0 }
   0x9   : > { %p41_p3 = scmp.ne.s32.totalorder %s1092_s19, %s1088_s18  ;;  %p42_p4 = scmp.eq.s32.totalorder %s1165_s22, 0 }
   0xa   : > { %s1181_s27 = scalar_select %p26_p1, %s1096_s20, %s28_s25  }
   0xb   : > { %p1183_p5 = por %p36_p2, %p35_p0  ;;  %p1187_p6 = por %p42_p4, %p41_p3 }
   0xc   : > { %p149_p7 = scmp.eq.s32.totalorder %s1165_s22, 1  ;;  %p155_p8 = scmp.eq.s32.totalorder %s826_s23, 1 }
   0xd   : > { %p876_p10 = scmp.lt.s32.totalorder %s1100_s21, 2  ;;  %s187_s7 = sand.u32 1, %s1096_s20  }
   0xe   : > { %p1194_p11 = por %p149_p7, %p35_p0  ;;  %p1198_p12 = por %p155_p8, %p41_p3 }
   0xf   : > { %s846_s8 = sshll.u32 %s1100_s21, 7  ;;  %s829_s9 = sshll.u32 %s187_s7, 3 }
  0x10   : > { %s1517_s30 = scalar_select %p1194_p11, 1, 0 }
  0x11   : > { %s1518_s6 = scalar_select %p1198_p12, 1, 0 }
  0x12   : > { %s1207_s12 = scalar_lea.hbm %s1508_s0, %s846_s8  ;;  %s191_s13 = scalar_lea.vmem [#allocation3], %s829_s9 }
  0x13   : > { %s199_s14 = sshll.u32 %s191_s13, 4  ;;  %p1211_p13 = pnand %p876_p10, %p1183_p5  ;;  %s1215_s14 = int_to_ptr.vmem [resolvable:$true] %s199_s14 }
  0x14   : > { %s188_s16 = scalar_lea.sflag [#allocation4], %s187_s7  ;;  %s1004_s17 = scalar_lea.hbm %s1207_s12, 128 }
  0x15   : > { %p1005_p2 = scmp.ne.s32.totalorder %s1207_s12, %s1004_s17  ;;  %p1006_p3 = pneg %p1211_p13 }
  0x16   : > { %s1009_s26 = scalar_lea.hbm %s1508_s0, 256  ;;  %p1010_p5 = scmp.lt.u32.totalorder %s1207_s12, %s1508_s0 }
  0x17   : > { %p1007_p4 = pnand %p1006_p3, %p1005_p2  ;;  %p1011_p8 = scmp.lt.u32.totalorder %s1009_s26, %s1004_s17 }
  0x18   : > { %p1013_p9 = scmp.lt.u32.totalorder %s1004_s17, %s1207_s12 }
  0x19   : > { %p1008_p7 = pneg %p1007_p4  ;;  %p1012_p10 = por %p1011_p8, %p1010_p5 }
  0x1b   : > { %p1014_p0 = por %p1013_p9, %p1012_p10 }
  0x1d   : > { %p1015_p1 = pnand %p1014_p0, %p1008_p7 }
  0x1f   : > { %1018 = shalt.err (!%p1015_p1)
}
  0x20   : > { %s1019_s7 = scalar_lea.vmem %s1215_s14, 128  ;;  %s1102_s9 = smov [#allocation3]  }
  0x21   : > { %p1020_p2 = scmp.ne.s32.totalorder %s1215_s14, %s1019_s7  ;;  %s1024_s10 = sshll.u32 %s1102_s9, 4  ;;  %s1025_s10 = int_to_ptr.vmem [resolvable:$false] %s1024_s10 }
  0x22   : > { %s1026_s11 = scalar_lea.vmem %s1025_s10, 256  ;;  %p1027_p11 = scmp.lt.s32.totalorder %s1215_s14, %s1025_s10 }
  0x23   : > { %p1022_p4 = pnand %p1020_p2, %p1006_p3  ;;  %p1028_p5 = scmp.lt.s32.totalorder %s1026_s11, %s1019_s7 }
  0x25   : > { %p1023_p12 = pneg %p1022_p4  ;;  %p1029_p8 = por %p1028_p5, %p1027_p11 }
  0x27   : > { %p1030_p9 = pnand %p1029_p8, %p1023_p12 }
  0x29   : > { %1033 = shalt.err (!%p1030_p9)
}
  0x2a   : > { %871 = dma.hbm_to_vmem [thread:$0]  (!%p1211_p13), %s1207_s12, 128, %s1215_s14, %s188_s16  }
  0x2b   : > { %p1520_p0 = scmp.lt.s32.totalorder %s1100_s21, 3  ;;  %p1521_p1 = scmp.ge.s32.totalorder %s1100_s21, 1 }
  0x2d   : > { %p205_p3 = pnand %p1521_p1, %p1520_p0 }
  0x2e   : > { %s1249_s13 = sand.u32 (!%p205_p3), 1, %s1092_s19  }
  0x2f   : > { %208 = sbr.rel (%p205_p3) target bundleno = 828 (0x33c), region = 40  ;;  %s833_s17 = sshll.u32 (!%p205_p3), %s1249_s13, 3 }
  0x30   : > { %s211_s23 = scalar_lea.sflag (!%p205_p3), [#allocation4], %s1249_s13  ;;  %s214_s15 = scalar_lea.vmem (!%p205_p3), [#allocation3], %s833_s17 }
  0x36   : > { %1079 = dma.done.wait (%p1187_p6), %s211_s23, 128  }
  0x37   : > { %1081 = vsyncadd (%p1187_p6), %s211_s23, 4294967168  ;;  %v1103_v0 = vmov 0.0   ;;  %v1259_v1 = vld [vmem:[%s214_s15] sm:$0xff]  ;;  %s1104_s12 = smov 15   ;;  %s1105_s14 = smov 1   ;;  %v1111_v15 = vmov 0   ;;  %v241_v17 = vlaneseq }
  0x38   : > { %272 = vst [vmem:[#allocation2] sm:$0xf] %v1103_v0  ;;  %273 = vst [vmem:[#allocation2 + $0xc] sm:$0xf] %v1103_v0  ;;  %504 = vmatprep.mubr.f32.mxu0 %v1103_v0  ;;  %728 = vmatprep.mubr.f32.mxu1 %v1103_v0  ;;  %s1106_s29 = smov 127   ;;  %s1107_s16 = smov 17   ;;  %v1271_v8 = vcombine.high %v1259_v1, %v1259_v1  ;;  %v401_v14 = vcombine.low %v1259_v1, %v1259_v1 }
  0x39   : > { %275 = vst [vmem:[#allocation2 + $0x4] sm:$0xff] %v1259_v1  ;;  %s1108_s25 = smov 16   ;;  %s1109_s26 = smov 113   ;;  %955 = vset.pattern.permute.xlu1 %v1111_v15  ;;  %991 = vset.pattern.permute.xlu0 %v1111_v15  ;;  %v424_v16 = vld [vmem:[%s1510_s2] sm:$0xf]  ;;  %v242_v18 = vand.u32 127, %v241_v17 }
  0x3a   : > { %s1110_s28 = smov 112   ;;  %s1112_s8 = smov 111   ;;  %vm321_vm0 = vcmask 7168   ;;  %vm291_vm2 = vcmask 138240   ;;  %vm381_vm6 = vcmask 130048   ;;  %vm308_vm7 = vcmask 121856  }
  0x3b   : > { %v243_v21 = vadd.s32 128, %v242_v18  ;;  %v248_v24 = vand.u32 15, %v242_v18  ;;  %vm414_vm8 = vcmask 1043456   ;;  %vm340_vm9 = vcmask 1039360   ;;  %s742_s7 = scalar_lea.sflag [#allocation5], %s1249_s13  ;;  %p1530_p11 = scmp.ne.s32.totalorder %s1517_s30, 0 }
  0x3c   : > { %vm353_vm10 = vcmask 924672   ;;  %vm409_vm11 = vcmask 916480   ;;  %vm366_vm12 = vcmask 908288   ;;  %vm430_vm13 = vcmask 293888  }
  0x3d   : > { %v255_v25 = vand.u32 15, %v243_v21  ;;  %vm1298_vm3 = vcmp.ne.s32.totalorder %v248_v24, 0  ;;  %vm1302_vm4 = vcmp.ne.s32.totalorder %v248_v24, 15 }
  0x3f   : > { %v330_v9 = vld [vmem:[#allocation2 + $0xc] sm:$0xf]  ;;  %vm1294_vm1 = vcmp.ne.s32.totalorder %v255_v25, 0  ;;  %vm1306_vm5 = vcmp.ne.s32.totalorder %v255_v25, 15 }
  0x40   : > { %v276_v2 = vld [vmem:[#allocation2] sm:$0xff]  ;;  %v277_v4 = vld [vmem:[#allocation2 + $0x8] sm:$0xf]  ;;  %v940_v10 = vpack.i.bf16 %v330_v9, %v1271_v8  ;;  %v402_v12 = vcombine.low %v330_v9, %v330_v9 }
  0x41   : > { %302 = vrot.lane.b32.xlu1 %v276_v2, %s1104_s12  ;;  %315 = vrot.lane.b32.xlu0 %v276_v2, %s1105_s14  ;;  %v284_v3 = vcombine.high %v276_v2, %v276_v2  ;;  %v374_v6 = vcombine.low %v277_v4, %v277_v4  ;;  %v373_v11 = vcombine.low %v276_v2, %v276_v2 }
  0x42   : > { %v950_v13 = vpack.i.bf16 %v402_v12, %v1259_v1 }
  0x43   : > { %v925_v5 = vpack.i.bf16 %v277_v4, %v284_v3  ;;  %v935_v7 = vpack.i.bf16 %v374_v6, %v276_v2 }
  0x45   : > { %334 = vrot.lane.b32.xlu1 %v1259_v1, %s1106_s29  ;;  %285 = vrot.lane.b32.xlu0 %v276_v2, %s1107_s16 }
  0x49   : > { %926 = vrot.lane.b32.xlu1 %v925_v5, %s1107_s16  ;;  %921 = vrot.lane.b32.xlu0 %v925_v5, %s1105_s14 }
  0x4d   : > { %931 = vrot.lane.b32.xlu1 %v925_v5, %s1104_s12  ;;  %936 = vrot.lane.b32.xlu0 %v935_v7, %s1108_s25 }
  0x51   : > { %941 = vrot.lane.b32.xlu1 %v940_v10, %s1106_s29  ;;  %375 = vrot.lane.b32.xlu0 %v373_v11, %s1108_s25 }
  0x55   : > { %946 = vrot.lane.b32.xlu0 %v940_v10, %s1109_s26  ;;  %347 = vrot.lane.b32.xlu1 %v1259_v1, %s1109_s26 }
  0x59   : > { %951 = vrot.lane.b32.xlu0 %v950_v13, %s1110_s28  ;;  %403 = vrot.lane.b32.xlu1 %v401_v14, %s1110_s28 }
  0x5d   : > { %362 = vrot.lane.b32.xlu0 %v1271_v8, %s1112_s8  ;;  %364 = vrot.lane.b32.xlu1 %v330_v9, %s1112_s8 }
  0x61   : > { %360 = vrot.lane.b32.xlu0 %v1259_v1, %s1112_s8  ;;  %427 = vperm.xlu1 %955, %v424_v16  }
  0xb3   : > { %v303_v19 = vpop.permute.xlu1 %302  ;;  %v316_v20 = vpop.permute.xlu0 %315 }
  0xb7   : > { %v335_v22 = vpop.permute.xlu1 %334  ;;  %v286_v23 = vpop.permute.xlu0 %285 }
  0xbb   : > { %v927_v26 = vpop.permute.xlu1 %926  ;;  %v922_v27 = vpop.permute.xlu0 %921 }
  0xbc   : > { %v929_v30 = vunpack.i.h.bf16 %v927_v26  ;;  %v928_v31 = vunpack.i.l.bf16 %v927_v26  ;;  %v924_v32 = vunpack.i.h.bf16 %v922_v27  ;;  %v923_v33 = vunpack.i.l.bf16 %v922_v27 }
  0xbe   : > { %v322_v36 = vsel %vm321_vm0, %v316_v20, %v923_v33  ;;  %v323_v37 = vsel %vm321_vm0, %v923_v33, %v924_v32  ;;  %v293_v38 = vsel %vm291_vm2, %v928_v31, %v929_v30  ;;  %v292_v39 = vsel %vm291_vm2, %v286_v23, %v928_v31 }
  0xbf   : > { %v932_v40 = vpop.permute.xlu1 %931  ;;  %v937_v41 = vpop.permute.xlu0 %936  ;;  %v297_v42 = vsel %vm1294_vm1, %v293_v38, 0.0  ;;  %v327_v43 = vsel %vm1294_vm1, %v323_v37, 0.0  ;;  %v326_v44 = vsel %vm1298_vm3, %v322_v36, 0.0  ;;  %v296_v49 = vsel %vm1298_vm3, %v292_v39, 0.0 }
  0xc0   : > { %v934_v45 = vunpack.i.h.bf16 %v932_v40  ;;  %v933_v46 = vunpack.i.l.bf16 %v932_v40  ;;  %v939_v47 = vunpack.i.h.bf16 %v937_v41  ;;  %v938_v48 = vunpack.i.l.bf16 %v937_v41 }
  0xc1   : > { %v389_v52 = vrot.slane %v327_v43, 4  ;;  %v388_v59 = vrot.slane %v326_v44, 4 }
  0xc2   : > { %v310_v50 = vsel %vm308_vm7, %v933_v46, %v934_v45  ;;  %v383_v51 = vsel %vm381_vm6, %v938_v48, %v939_v47  ;;  %v309_v53 = vsel %vm308_vm7, %v303_v19, %v933_v46 }
  0xc3   : > { %v942_v54 = vpop.permute.xlu1 %941  ;;  %v376_v55 = vpop.permute.xlu0 %375  ;;  %v314_v56 = vsel %vm1306_vm5, %v310_v50, 0.0  ;;  %v416_v57 = vsel %vm414_vm8, %v297_v42, %v383_v51  ;;  %v313_v58 = vsel %vm1302_vm4, %v309_v53, 0.0  ;;  %v423_v42 = vld [vmem:[%s1509_s1] sm:$0xf]  ;;  %v561_v51 = vld [vmem:[#allocation2 + $0xc] sm:$0xf] }
  0xc4   : > { %v944_v60 = vunpack.i.h.bf16 %v942_v54  ;;  %v943_v61 = vunpack.i.l.bf16 %v942_v54  ;;  %v382_v62 = vsel %vm381_vm6, %v376_v55, %v938_v48  ;;  %v418_v63 = vsel %vm414_vm8, %v314_v56, %v389_v52 }
  0xc5   : > { %v848_v0 = vpack.c.bf16 %v418_v63, %v416_v57  ;;  %v415_v2 = vsel %vm414_vm8, %v296_v49, %v382_v62  ;;  %v417_v3 = vsel %vm414_vm8, %v313_v58, %v388_v59  ;;  %v629_v52 = vcombine.low %v561_v51, %v561_v51 }
  0xc6   : > { %v341_v4 = vsel %vm340_vm9, %v335_v22, %v943_v61  ;;  %v342_v5 = vsel %vm340_vm9, %v943_v61, %v944_v60  ;;  %v850_v6 = vpack.c.bf16 %v417_v3, %v415_v2 }
  0xc7   : > { %v947_v7 = vpop.permute.xlu0 %946  ;;  %849 = vmatprep.subr.bf16.mxu0 %v848_v0  ;;  %v348_v9 = vpop.permute.xlu1 %347  ;;  %v345_v10 = vsel %vm1302_vm4, %v341_v4, 0.0  ;;  %v346_v11 = vsel %vm1306_vm5, %v342_v5, 0.0  ;;  %v649_v0 = vld [vmem:[%s1512_s4] sm:$0xf] }
  0xc8   : > { %v949_v12 = vunpack.i.h.bf16 %v947_v7  ;;  %v948_v13 = vunpack.i.l.bf16 %v947_v7  ;;  %851 = vmatpush1.bf16.msra.mxu0 %v850_v6  ;;  %v397_v14 = vrot.slane %v345_v10, 4  ;;  %v398_v15 = vrot.slane %v346_v11, 4 }
  0xca   : > { %v354_v16 = vsel %vm353_vm10, %v348_v9, %v948_v13  ;;  %v355_v19 = vsel %vm353_vm10, %v948_v13, %v949_v12  ;;  %v420_v31 = vsel %vm414_vm8, %v1271_v8, %v398_v15  ;;  %v419_v33 = vsel %vm414_vm8, %v1259_v1, %v397_v14 }
  0xcb   : > { %v952_v17 = vpop.permute.xlu0 %951  ;;  %v404_v18 = vpop.permute.xlu1 %403  ;;  %v358_v22 = vsel %vm1298_vm3, %v354_v16, 0.0  ;;  %v359_v24 = vsel %vm1294_vm1, %v355_v19, 0.0 }
  0xcc   : > { %v954_v20 = vunpack.i.h.bf16 %v952_v17  ;;  %v953_v21 = vunpack.i.l.bf16 %v952_v17 }
  0xce   : > { %v410_v23 = vsel %vm409_vm11, %v404_v18, %v953_v21  ;;  %v411_v25 = vsel %vm409_vm11, %v953_v21, %v954_v20 }
  0xcf   : > { %v421_v26 = vsel %vm414_vm8, %v358_v22, %v410_v23  ;;  %v363_v27 = vpop.permute.xlu0 %362  ;;  %v365_v30 = vpop.permute.xlu1 %364  ;;  %v422_v32 = vsel %vm414_vm8, %v359_v24, %v411_v25 }
  0xd0   : > { %v368_v36 = vsel %vm366_vm12, %v363_v27, %v365_v30  ;;  %v852_v37 = vpack.c.bf16 %v422_v32, %v420_v31  ;;  %v854_v38 = vpack.c.bf16 %v421_v26, %v419_v33 }
  0xd1   : > { %v372_v39 = vsel %vm1306_vm5, %v368_v36, 0.0 }
  0xd2   : > { %853 = vmatprep.subr.bf16.mxu0 %v852_v37 }
  0xd3   : > { %v361_v40 = vpop.permute.xlu0 %360  ;;  %855 = vmatpush1.bf16.msra.mxu0 %v854_v38 }
  0xd4   : > { %v367_v41 = vsel %vm366_vm12, %v361_v40, %v363_v27  ;;  %835 = vmatprep.subr.msk.mxu0 %vm414_vm8, %v372_v39 }
  0xd5   : > { %v371_v8 = vsel %vm1302_vm4, %v367_v41, 0.0 }
  0xd7   : > { %836 = vmatpush1.msk.msra.mxu0 %vm414_vm8, %v371_v8 }
  0xd8   : > { %837 = vmatmul.mubr.msk.f32.vlgmr.msra.gmra.mrb[0].mxu0 %vm430_vm13, %v423_v42 }
  0xe0   : > { %v428_v43 = vpop.permute.xlu1 %427 }
 0x1ab   : > { %v506_v44 = vpop.f32.mrb[0].mxu0 }
 0x1ac   : > { %v507_v45 = vadd.f32 %v506_v44, %v428_v43  ;;  %v508_v46 = vpop.f32.mrb[1].mxu0 }
 0x1ad   : > { %v509_v47 = vadd.f32 %v508_v46, %v428_v43 }
 0x1ae   : > { %v511_v48 = vmax.f32 %v507_v45, 0.0 }
 0x1af   : > { %v512_v49 = vmax.f32 %v509_v47, 0.0 }
 0x1b0   : > { %v1003_v63 = vcombine.low %v511_v48, %v511_v48 }
 0x1b1   : > { %v1366_v50 = vcombine.low %v511_v48, %v512_v49  ;;  %v1380_v60 = vcombine.low %v512_v49, %v512_v49 }
 0x1b3   : > { %517 = vst [vmem:[#allocation2 + $0x4] sm:$0xff] %v1366_v50  ;;  %v956_v54 = vpack.i.bf16 %v629_v52, %v1366_v50  ;;  %v981_v61 = vpack.i.bf16 %v561_v51, %v1380_v60 }
 0x1ba   : > { %v518_v53 = vld [vmem:[#allocation2] sm:$0xff]  ;;  %v519_v56 = vld [vmem:[#allocation2 + $0x8] sm:$0xf] }
 0x1bb   : > { %523 = vrot.lane.b32.xlu0 %v518_v53, %s1107_s16  ;;  %547 = vrot.lane.b32.xlu1 %v518_v53, %s1105_s14  ;;  %v522_v55 = vcombine.high %v518_v53, %v518_v53  ;;  %v602_v58 = vcombine.low %v519_v56, %v519_v56  ;;  %v601_v62 = vcombine.low %v518_v53, %v518_v53 }
 0x1bd   : > { %v961_v57 = vpack.i.bf16 %v519_v56, %v522_v55  ;;  %v976_v59 = vpack.i.bf16 %v602_v58, %v518_v53 }
 0x1bf   : > { %957 = vrot.lane.b32.xlu0 %v956_v54, %s1110_s28  ;;  %535 = vrot.lane.b32.xlu1 %v518_v53, %s1104_s12 }
 0x1c3   : > { %565 = vrot.lane.b32.xlu1 %v1366_v50, %s1106_s29  ;;  %962 = vrot.lane.b32.xlu0 %v961_v57, %s1105_s14 }
 0x1c7   : > { %577 = vrot.lane.b32.xlu1 %v1366_v50, %s1109_s26  ;;  %967 = vrot.lane.b32.xlu0 %v961_v57, %s1107_s16  ;;  %s240_s16 = scalar_lea.vmem [#allocation6], %s833_s17 }
 0x1cb   : > { %972 = vrot.lane.b32.xlu1 %v961_v57, %s1104_s12  ;;  %977 = vrot.lane.b32.xlu0 %v976_v59, %s1108_s25 }
 0x1cf   : > { %982 = vrot.lane.b32.xlu1 %v981_v61, %s1106_s29  ;;  %603 = vrot.lane.b32.xlu0 %v601_v62, %s1108_s25  ;;  %s847_s29 = sshll.u32 %s1165_s22, 7  ;;  %s756_s25 = sshll.u32 %s240_s16, 4  ;;  %s1466_s25 = int_to_ptr.vmem [resolvable:$true] %s756_s25 }
 0x1d0   : > { %s1034_s9 = scalar_lea.vmem %s1466_s25, 128  ;;  %s1113_s22 = smov [#allocation6]  }
 0x1d1   : > { %p1035_p6 = scmp.ne.s32.totalorder %s1466_s25, %s1034_s9  ;;  %s1038_s17 = sshll.u32 %s1113_s22, 4  ;;  %s1039_s17 = int_to_ptr.vmem [resolvable:$false] %s1038_s17 }
 0x1d2   : > { %s1040_s10 = scalar_lea.vmem %s1039_s17, 256  ;;  %p1041_p7 = scmp.lt.s32.totalorder %s1466_s25, %s1039_s17 }
 0x1d3   : > { %630 = vrot.lane.b32.xlu1 %v1003_v63, %s1110_s28  ;;  %987 = vrot.lane.b32.xlu0 %v981_v61, %s1109_s26  ;;  %p1036_p12 = pnand %p1035_p6, %p1530_p11  ;;  %p1042_p10 = scmp.lt.s32.totalorder %s1040_s10, %s1034_s9 }
 0x1d5   : > { %p1037_p13 = pneg %p1036_p12  ;;  %p1043_p2 = por %p1042_p10, %p1041_p7 }
 0x1d7   : > { %593 = vrot.lane.b32.xlu1 %v561_v51, %s1112_s8  ;;  %591 = vrot.lane.b32.xlu0 %v1380_v60, %s1112_s8  ;;  %p1044_p4 = pnand %p1043_p2, %p1037_p13 }
 0x1db   : > { %652 = vperm.xlu1 %955, %v649_v0   ;;  %589 = vrot.lane.b32.xlu0 %v1366_v50, %s1112_s8  ;;  %s1464_s8 = scalar_lea.hbm %s1513_s5, %s847_s29 }
 0x22d   : > { %v524_v2 = vpop.permute.xlu0 %523  ;;  %v548_v3 = vpop.permute.xlu1 %547 }
 0x231   : > { %v1397_v4 = vpop.permute.xlu0 %957  ;;  %v536_v5 = vpop.permute.xlu1 %535 }
 0x232   : > { %v960_v57 = vunpack.i.h.bf16 %v1397_v4  ;;  %v959_v58 = vunpack.i.l.bf16 %v1397_v4 }
 0x235   : > { %v566_v6 = vpop.permute.xlu1 %565  ;;  %v963_v7 = vpop.permute.xlu0 %962 }
 0x236   : > { %v965_v9 = vunpack.i.h.bf16 %v963_v7  ;;  %v964_v10 = vunpack.i.l.bf16 %v963_v7 }
 0x238   : > { %v553_v11 = vsel %vm321_vm0, %v548_v3, %v964_v10  ;;  %v554_v12 = vsel %vm321_vm0, %v964_v10, %v965_v9 }
 0x239   : > { %v578_v13 = vpop.permute.xlu1 %577  ;;  %v968_v14 = vpop.permute.xlu0 %967  ;;  %v558_v17 = vsel %vm1294_vm1, %v554_v12, 0.0  ;;  %v557_v18 = vsel %vm1298_vm3, %v553_v11, 0.0 }
 0x23a   : > { %v970_v15 = vunpack.i.h.bf16 %v968_v14  ;;  %v969_v16 = vunpack.i.l.bf16 %v968_v14  ;;  %v616_v27 = vrot.slane %v558_v17, 4  ;;  %v615_v30 = vrot.slane %v557_v18, 4 }
 0x23c   : > { %v530_v21 = vsel %vm291_vm2, %v969_v16, %v970_v15  ;;  %v529_v22 = vsel %vm291_vm2, %v524_v2, %v969_v16 }
 0x23d   : > { %v973_v19 = vpop.permute.xlu1 %972  ;;  %v978_v20 = vpop.permute.xlu0 %977  ;;  %v534_v31 = vsel %vm1294_vm1, %v530_v21, 0.0  ;;  %v533_v41 = vsel %vm1298_vm3, %v529_v22, 0.0 }
 0x23e   : > { %v975_v23 = vunpack.i.h.bf16 %v973_v19  ;;  %v974_v24 = vunpack.i.l.bf16 %v973_v19  ;;  %v980_v25 = vunpack.i.h.bf16 %v978_v20  ;;  %v979_v26 = vunpack.i.l.bf16 %v978_v20 }
 0x240   : > { %v542_v32 = vsel %vm308_vm7, %v974_v24, %v975_v23  ;;  %v610_v33 = vsel %vm381_vm6, %v979_v26, %v980_v25  ;;  %v541_v36 = vsel %vm308_vm7, %v536_v5, %v974_v24 }
 0x241   : > { %v983_v37 = vpop.permute.xlu1 %982  ;;  %v604_v38 = vpop.permute.xlu0 %603  ;;  %v546_v39 = vsel %vm1306_vm5, %v542_v32, 0.0  ;;  %v641_v40 = vsel %vm414_vm8, %v534_v31, %v610_v33  ;;  %v545_v8 = vsel %vm1302_vm4, %v541_v36, 0.0 }
 0x242   : > { %v985_v42 = vunpack.i.h.bf16 %v983_v37  ;;  %v984_v43 = vunpack.i.l.bf16 %v983_v37  ;;  %v609_v44 = vsel %vm381_vm6, %v604_v38, %v979_v26  ;;  %v643_v45 = vsel %vm414_vm8, %v546_v39, %v616_v27 }
 0x243   : > { %v856_v46 = vpack.c.bf16 %v643_v45, %v641_v40  ;;  %v640_v47 = vsel %vm414_vm8, %v533_v41, %v609_v44  ;;  %v642_v48 = vsel %vm414_vm8, %v545_v8, %v615_v30 }
 0x244   : > { %v571_v49 = vsel %vm340_vm9, %v566_v6, %v984_v43  ;;  %v572_v51 = vsel %vm340_vm9, %v984_v43, %v985_v42  ;;  %v858_v52 = vpack.c.bf16 %v642_v48, %v640_v47  ;;  %v637_v6 = vsel %vm409_vm11, %v959_v58, %v960_v57 }
 0x245   : > { %v575_v53 = vsel %vm1302_vm4, %v571_v49, 0.0  ;;  %v576_v54 = vsel %vm1306_vm5, %v572_v51, 0.0  ;;  %v631_v55 = vpop.permute.xlu1 %630  ;;  %v988_v56 = vpop.permute.xlu0 %987  ;;  %857 = vmatprep.subr.bf16.mxu1 %v856_v46 }
 0x246   : > { %v990_v59 = vunpack.i.h.bf16 %v988_v56  ;;  %859 = vmatpush1.bf16.msra.mxu1 %v858_v52  ;;  %v624_v61 = vrot.slane %v575_v53, 4  ;;  %v625_v62 = vrot.slane %v576_v54, 4  ;;  %v989_v63 = vunpack.i.l.bf16 %v988_v56 }
 0x247   : > { %v636_v7 = vsel %vm409_vm11, %v631_v55, %v959_v58 }
 0x248   : > { %v583_v0 = vsel %vm353_vm10, %v578_v13, %v989_v63  ;;  %v584_v2 = vsel %vm353_vm10, %v989_v63, %v990_v59  ;;  %v645_v10 = vsel %vm414_vm8, %v1380_v60, %v625_v62  ;;  %v644_v12 = vsel %vm414_vm8, %v1366_v50, %v624_v61  ;;  %v648_v50 = vld [vmem:[%s1511_s3] sm:$0xf] }
 0x249   : > { %v594_v3 = vpop.permute.xlu1 %593  ;;  %v592_v5 = vpop.permute.xlu0 %591  ;;  %v588_v9 = vsel %vm1294_vm1, %v584_v2, 0.0  ;;  %v587_v4 = vsel %vm1298_vm3, %v583_v0, 0.0 }
 0x24a   : > { %v647_v11 = vsel %vm414_vm8, %v588_v9, %v637_v6  ;;  %v646_v13 = vsel %vm414_vm8, %v587_v4, %v636_v7  ;;  %v596_v14 = vsel %vm366_vm12, %v592_v5, %v594_v3 }
 0x24b   : > { %v860_v15 = vpack.c.bf16 %v647_v11, %v645_v10  ;;  %v862_v16 = vpack.c.bf16 %v646_v13, %v644_v12  ;;  %v600_v29 = vsel %vm1306_vm5, %v596_v14, 0.0 }
 0x24d   : > { %v590_v28 = vpop.permute.xlu0 %589  ;;  %861 = vmatprep.subr.bf16.mxu1 %v860_v15 }
 0x24e   : > { %v595_v60 = vsel %vm366_vm12, %v590_v28, %v592_v5  ;;  %863 = vmatpush1.bf16.msra.mxu1 %v862_v16 }
 0x24f   : > { %838 = vmatprep.subr.msk.mxu1 %vm414_vm8, %v600_v29  ;;  %v599_v17 = vsel %vm1302_vm4, %v595_v60, 0.0 }
 0x252   : > { %839 = vmatpush1.msk.msra.mxu1 %vm414_vm8, %v599_v17 }
 0x253   : > { %840 = vmatmul.mubr.msk.f32.vlgmr.msra.gmra.mrb[0].mxu1 %vm430_vm13, %v648_v50 }
 0x25a   : > { %v653_v18 = vpop.permute.xlu1 %652 }
 0x326   : > { %v730_v35 = vpop.f32.mrb[0].mxu1 }
 0x327   : > { %v731_v19 = vadd.f32 %v730_v35, %v653_v18  ;;  %v732_v20 = vpop.f32.mrb[1].mxu1 }
 0x328   : > { %v733_v21 = vadd.f32 %v732_v20, %v653_v18 }
 0x32a   : > { %v737_v22 = vcombine.low %v731_v19, %v733_v21 }
 0x32c   : > { %v739_v23 = vadd.f32 %v737_v22, %v1259_v1 }
 0x32e   : > { %740 = vst [vmem:[%s240_s16] sm:$0xff] %v739_v23 }
 0x32f   : > { %1047 = shalt.err (!%p1044_p4)
}
 0x330   : > { %s1048_s13 = scalar_lea.hbm %s1464_s8, 128  ;;  %s1052_s15 = scalar_lea.hbm %s1513_s5, 256 }
 0x331   : > { %p1049_p5 = scmp.ne.s32.totalorder %s1464_s8, %s1048_s13  ;;  %p1053_p0 = scmp.lt.u32.totalorder %s1464_s8, %s1513_s5 }
 0x332   : > { %p1054_p1 = scmp.lt.u32.totalorder %s1052_s15, %s1048_s13  ;;  %p1056_p6 = scmp.lt.u32.totalorder %s1048_s13, %s1464_s8 }
 0x333   : > { %p1050_p8 = pnand %p1049_p5, %p1530_p11 }
 0x334   : > { %p1055_p3 = por %p1054_p1, %p1053_p0 }
 0x335   : > { %p1051_p9 = pneg %p1050_p8 }
 0x336   : > { %p1057_p12 = por %p1056_p6, %p1055_p3 }
 0x338   : > { %p1058_p13 = pnand %p1057_p12, %p1051_p9 }
 0x33a   : > { %1061 = shalt.err (!%p1058_p13)
}
 0x33b   : > { %866 = dma.vmem_to_hbm [thread:$0]  (%p1530_p11), %s1466_s25, 128, %s1464_s8, %s742_s7  }
 0x33c PF: > { %s768_s29 = sand.u32 1, %s1088_s18   ;;  %p1531_p7 = scmp.ne.s32.totalorder %s1518_s6, 0 }
 0x33d   : > { %p1532_p10 = scmp.ge.s32.totalorder %s1100_s21, 2  ;;  %s769_s16 = scalar_lea.sflag [#allocation5], %s768_s29 }
 0x33f   : > { %p873_p2 = pnand %p1532_p10, %p1531_p7 }
 0x341   : > { %1083 = dma.done.wait (!%p873_p2), %s769_s16, 128  }
 0x342   : > { %1085 = vsyncadd (!%p873_p2), %s769_s16, 4294967168  ;;  %p18_p4 = scmp.ge.s32.totalorder %s1169_s24, 4   ;;  %s1533_s18 = smov %s1092_s19 }
 0x343   : > { %s1534_s19 = smov %s1096_s20  ;;  %s1535_s20 = smov %s1181_s27 }
 0x344   : > { %s1536_s21 = smov %s1169_s24  ;;  %20 = sbr.rel (!%p18_p4) target bundleno = 5 (0x5), region = 85 }
 0x34b   :  { %774 = vsyncpa [#allocation4], 1 }
 0x34c   :  { %776 = vsyncpa [#allocation4 + $0x1], 1 }
 0x34d   :  { %777 = vsyncpa [#allocation5], 1 }
 0x34e   :  { %779 = vsyncpa [#allocation5 + $0x1], 1 }

</bundles_post_ra>
